<compile_context>
chip_gen: v6e
topology: v6e:2x2x1
jax: 0.10.0
libtpu: 0.0.40
codegen_flags: <defaults>
</compile_context>

<pallas_src>
import functools

import jax
import jax.numpy as jnp
from jax.experimental import pallas as pl
from jax.experimental.pallas import tpu as pltpu


# ----------------------------------------------------------------------------
# hardware-aware budgets / tiling helpers
# ----------------------------------------------------------------------------
def _vmem_budget_bytes():
    """(double-buffered working-set budget, vmem_limit_bytes) per chip gen."""
    cap = None
    try:
        cap = int(pltpu.get_tpu_info().vmem_capacity_bytes)
    except Exception:
        cap = None
    if cap is not None and cap > (64 << 20):      # v5e / v6e: 128 MiB VMEM
        return 20 << 20, 48 << 20
    # v7x (64 MiB physical / 32 MiB scoped default) or unknown: conservative.
    return 14 << 20, 28 << 20


def _divisors(n):
    small, large = [], []
    d = 1
    while d * d <= n:
        if n % d == 0:
            small.append(d)
            if d != n // d:
                large.append(n // d)
        d += 1
    return small + large[::-1]


def _sublane(itemsize):
    # sublane packing unit: 8 for f32, 16 for bf16, 32 for int8/fp8
    return max(8, 32 // itemsize)


def _choose_tiling_3d(B, C, HW, itemsize, *, with_noise_input, budget):
    """Pick (batch-block, spatial-tile) for the (B, C, HW) layout."""
    sub = _sublane(itemsize)
    c_pad = -(-C // sub) * sub                          # feat-in / out channel pad
    rows = 2 * c_pad + (sub if with_noise_input else 0)  # + padded noise row
    col_bytes = rows * itemsize * 2                     # x2: double buffering
    # spatial tile: largest 128-aligned divisor of HW that fits with bt = 1
    aligned = [128 * d for d in _divisors(HW // 128)]
    cap_cols = max(128, budget // col_bytes)
    tile = max([t for t in aligned if t <= cap_cols], default=128)
    # batch block: largest divisor of B keeping the (bt, C, tile) set in budget
    divs = _divisors(B)
    fits = [d for d in divs if d * col_bytes * tile <= budget]
    bt = max(fits) if fits else 1
    # TODO(synk): for extremely large C the single (1, C, 128) block can still
    # exceed the budget; a channel-split grid axis would be needed there.
    # keep >= 2 grid steps so both v7x TensorCores get work ("parallel" axes)
    if (B // bt) * (HW // tile) < 2:
        if tile % 256 == 0:
            tile //= 2
        elif bt > 1:
            bt = max([d for d in divs if d <= B // 2], default=1)
    return bt, tile


def _choose_batch_block_2d(B, L, itemsize, budget):
    """Batch block for the flattened (B, L) fallback layout.

    The batch axis sits on the sublanes here, so legal block sizes are either
    the full batch or a multiple of 8 that divides B.
    """
    sub = _sublane(itemsize)
    lane_pad = -(-L // 128) * 128

    def blk_bytes(bt):
        return 3 * (-(-bt // sub) * sub) * lane_pad * itemsize * 2

    candidates = [d for d in _divisors(B) if d == B or d % 8 == 0]
    fits = [d for d in candidates if blk_bytes(d) <= budget]
    if not fits:
        # even one batch row over budget: take the full extent (always legal).
        # TODO(synk): tile the flattened axis too for huge non-128 maps.
        return B
    bt = max(fits)
    if B // bt < 2:   # try to keep both v7x TensorCores busy
        smaller = [d for d in candidates if d <= B // 2 and blk_bytes(d) <= budget]
        if smaller:
            bt = max(smaller)
    return bt


# ----------------------------------------------------------------------------
# kernels
# ----------------------------------------------------------------------------
def _add_noise_kernel(w_ref, feat_ref, noise_ref, out_ref):
    """out = feat + w * noise (noise broadcast across the channel sublanes).

    w_ref     : SMEM (1,) f32 scalar weight
    feat_ref  : VMEM (Bt, C, T)   [or (Bt, L) on the flattened fallback path]
    noise_ref : VMEM (Bt, 1, T)   [or (Bt, L)]
    out_ref   : VMEM, same shape as feat_ref
    """
    w = w_ref[0].astype(out_ref.dtype)          # compute in the feature dtype
    out_ref[...] = (feat_ref[...] + w * noise_ref[...]).astype(out_ref.dtype)


def _gen_noise_kernel(w_ref, seed_ref, feat_ref, out_ref):
    """out = feat + w * N(0,1); noise drawn in-kernel, shared across channels."""
    bt, _, t = feat_ref.shape
    # independent stream per (batch-block, spatial-tile) grid step
    pltpu.prng_seed(seed_ref[0]
                    + pl.program_id(0) * pl.num_programs(1)
                    + pl.program_id(1))
    noise = pltpu.stateful_normal((bt, t), jnp.float32).astype(out_ref.dtype)
    w = w_ref[0].astype(out_ref.dtype)
    out_ref[...] = (feat_ref[...] + w * noise[:, None, :]).astype(out_ref.dtype)


@functools.cache
def _in_kernel_rng_available():
    """Probe whether the stateful-normal in-kernel RNG lowers on this build."""
    if not (hasattr(pltpu, "prng_seed") and hasattr(pltpu, "stateful_normal")):
        return False

    def _probe(seed_ref, o_ref):
        pltpu.prng_seed(seed_ref[0])
        o_ref[...] = pltpu.stateful_normal(o_ref.shape, jnp.float32)

    try:
        fn = pl.pallas_call(
            _probe,
            in_specs=[pl.BlockSpec(memory_space=pltpu.MemorySpace.SMEM)],
            out_shape=jax.ShapeDtypeStruct((8, 128), jnp.float32),
        )
        jax.jit(fn).lower(jax.ShapeDtypeStruct((1,), jnp.int32)).compile()
        return True
    except Exception:
        return False


# ----------------------------------------------------------------------------
# wrappers
# ----------------------------------------------------------------------------
def _noise_injection_flat(feat_nchw, w, noise):
    """HW not a multiple of 128: lane-dense flattened (B, C*H*W) layout."""
    B, C, H, W = feat_nchw.shape
    dtype = feat_nchw.dtype
    L = C * H * W
    feat2 = feat_nchw.reshape(B, L)
    noise2 = jnp.broadcast_to(
        jnp.asarray(noise, dtype).reshape(B, 1, H * W), (B, C, H * W)
    ).reshape(B, L)

    budget, vmem_limit = _vmem_budget_bytes()
    bt = _choose_batch_block_2d(B, L, dtype.itemsize, budget)

    out = pl.pallas_call(
        _add_noise_kernel,
        grid=(B // bt,),
        in_specs=[
            pl.BlockSpec(memory_space=pltpu.MemorySpace.SMEM),   # weight
            pl.BlockSpec((bt, L), lambda b: (b, 0)),             # feat
            pl.BlockSpec((bt, L), lambda b: (b, 0)),             # noise (pre-broadcast)
        ],
        out_specs=pl.BlockSpec((bt, L), lambda b: (b, 0)),
        out_shape=jax.ShapeDtypeStruct((B, L), dtype),
        compiler_params=pltpu.CompilerParams(
            dimension_semantics=("parallel",),
            vmem_limit_bytes=vmem_limit),
    )(w, feat2, noise2)
    return out.reshape(B, C, H, W)


def noise_injection(feat_nchw, weight, noise=None, *, seed=0):
    """Pallas TPU implementation of NoiseInjection.forward.

    feat_nchw : (B, C, H, W)
    weight    : scalar (the nn.Parameter of shape (1,))
    noise     : optional (B, 1, H, W); if None, Gaussian noise is generated
                (in-kernel when supported, otherwise in the wrapper) from `seed`.
    """
    B, C, H, W = feat_nchw.shape
    dtype = feat_nchw.dtype
    HW = H * W
    w = jnp.asarray(weight, jnp.float32).reshape(1)

    gen_in_kernel = (noise is None and HW % 128 == 0
                     and _in_kernel_rng_available())

    if noise is None and not gen_in_kernel:
        # torch.randn equivalent (drawn in f32 then cast to the feature dtype)
        noise = jax.random.normal(jax.random.PRNGKey(seed), (B, 1, H, W),
                                  dtype=jnp.float32)

    if HW % 128 != 0:
        return _noise_injection_flat(feat_nchw, w, noise)

    feat2 = feat_nchw.reshape(B, C, HW)     # channels on sublanes, H*W on lanes
    budget, vmem_limit = _vmem_budget_bytes()
    bt, tile = _choose_tiling_3d(B, C, HW, dtype.itemsize,
                                 with_noise_input=not gen_in_kernel,
                                 budget=budget)
    grid = (B // bt, HW // tile)
    cparams = pltpu.CompilerParams(
        dimension_semantics=("parallel", "parallel"),
        vmem_limit_bytes=vmem_limit)

    if gen_in_kernel:
        seed_arr = jnp.asarray(seed, jnp.int32).reshape(1)
        out = pl.pallas_call(
            _gen_noise_kernel,
            grid=grid,
            in_specs=[
                pl.BlockSpec(memory_space=pltpu.MemorySpace.SMEM),      # weight
                pl.BlockSpec(memory_space=pltpu.MemorySpace.SMEM),      # seed
                pl.BlockSpec((bt, C, tile), lambda b, j: (b, 0, j)),    # feat
            ],
            out_specs=pl.BlockSpec((bt, C, tile), lambda b, j: (b, 0, j)),
            out_shape=jax.ShapeDtypeStruct((B, C, HW), dtype),
            compiler_params=cparams,
        )(w, seed_arr, feat2)
    else:
        noise2 = jnp.asarray(noise, dtype).reshape(B, 1, HW)
        out = pl.pallas_call(
            _add_noise_kernel,
            grid=grid,
            in_specs=[
                pl.BlockSpec(memory_space=pltpu.MemorySpace.SMEM),      # weight
                pl.BlockSpec((bt, C, tile), lambda b, j: (b, 0, j)),    # feat
                pl.BlockSpec((bt, 1, tile), lambda b, j: (b, 0, j)),    # noise row
            ],
            out_specs=pl.BlockSpec((bt, C, tile), lambda b, j: (b, 0, j)),
            out_shape=jax.ShapeDtypeStruct((B, C, HW), dtype),
            compiler_params=cparams,
        )(w, feat2, noise2)

    return out.reshape(B, C, H, W)


# ----------------------------------------------------------------------------
if __name__ == "__main__":
    B, C, H, W = 2, 4, 16, 16
    key = jax.random.PRNGKey(0)
    k_feat, k_noise, k_w = jax.random.split(key, 3)

    feat = jax.random.normal(k_feat, (B, C, H, W), dtype=jnp.float32)
    noise = jax.random.normal(k_noise, (B, 1, H, W), dtype=jnp.float32)
    # nn.Parameter initializes to 0.0; use a nonzero value so the noise path
    # is actually exercised in the reference comparison.
    weight = jax.random.normal(k_w, (), dtype=jnp.float32)

    # 1) explicit-noise path: exact reference check
    out = jax.block_until_ready(noise_injection(feat, weight, noise))
    ref = feat + weight * noise
    assert out.shape == (B, C, H, W) and out.dtype == jnp.float32
    assert bool(jnp.allclose(out, ref, atol=1e-6, rtol=1e-6))

    # 2) noise=None path with weight == 0 must be an exact identity
    out_id = jax.block_until_ready(
        noise_injection(feat, jnp.zeros(()), None, seed=7))
    assert bool(jnp.allclose(out_id, feat))

    # 3) noise=None path with a nonzero weight: finite, right shape/dtype
    out_rand = jax.block_until_ready(noise_injection(feat, weight, None, seed=7))
    assert out_rand.shape == (B, C, H, W) and out_rand.dtype == jnp.float32
    assert bool(jnp.all(jnp.isfinite(out_rand)))

    # 4) HW < 128 fallback path (flattened lane-dense layout)
    feat_s = jax.random.normal(k_feat, (B, C, 8, 8), dtype=jnp.float32)
    noise_s = jax.random.normal(k_noise, (B, 1, 8, 8), dtype=jnp.float32)
    out_s = jax.block_until_ready(noise_injection(feat_s, weight, noise_s))
    assert bool(jnp.allclose(out_s, feat_s + weight * noise_s,
                             atol=1e-6, rtol=1e-6))

    # 5) bf16 path: compute stays in bf16 (weight cast in-kernel)
    feat_h = feat.astype(jnp.bfloat16)
    noise_h = noise.astype(jnp.bfloat16)
    out_h = jax.block_until_ready(noise_injection(feat_h, weight, noise_h))
    ref_h = feat_h + weight.astype(jnp.bfloat16) * noise_h
    assert out_h.dtype == jnp.bfloat16
    assert bool(jnp.allclose(out_h.astype(jnp.float32),
                             ref_h.astype(jnp.float32), atol=0.1, rtol=0.05))

    print("KERNEL_OK")
</pallas_src>

<mosaic_0001>
module attributes {stable_mosaic.version = 11 : i64} {
  func.func @_add_noise_kernel(%arg0: i32, %arg1: i32, %arg2: memref<1xf32, #tpu.memory_space<smem>>, %arg3: memref<2x4x128xf32, #tpu.memory_space<vmem>>, %arg4: memref<2x1x128xf32, #tpu.memory_space<vmem>>, %arg5: memref<2x4x128xf32, #tpu.memory_space<vmem>>) attributes {dimension_semantics = [#tpu.dimension_semantics<parallel>, #tpu.dimension_semantics<parallel>], iteration_bounds = array<i64: 1, 2>, scalar_prefetch = 0 : i64, scratch_operands = 0 : i64, tpu.core_type = #tpu.core_type<tc>, window_params = [{transform_indices = @transform_0, window_bounds = array<i64: 1>}, {transform_indices = @transform_1, window_bounds = array<i64: 2, 4, 128>}, {transform_indices = @transform_2, window_bounds = array<i64: 2, 1, 128>}, {transform_indices = @transform_3, window_bounds = array<i64: 2, 4, 128>}]} {
    %c0 = arith.constant 0 : index
    %0 = memref.load %arg2[%c0] : memref<1xf32, #tpu.memory_space<smem>>
    %c0_0 = arith.constant 0 : index
    %c0_1 = arith.constant 0 : index
    %c0_2 = arith.constant 0 : index
    %1 = vector.load %arg3[%c0_0, %c0_1, %c0_2] : memref<2x4x128xf32, #tpu.memory_space<vmem>>, vector<2x4x128xf32>
    %c0_3 = arith.constant 0 : index
    %c0_4 = arith.constant 0 : index
    %c0_5 = arith.constant 0 : index
    %2 = vector.load %arg4[%c0_3, %c0_4, %c0_5] : memref<2x1x128xf32, #tpu.memory_space<vmem>>, vector<2x1x128xf32>
    %3 = vector.broadcast %0 : f32 to vector<2x1x128xf32>
    %4 = arith.mulf %3, %2 : vector<2x1x128xf32>
    %5 = vector.broadcast %4 : vector<2x1x128xf32> to vector<2x4x128xf32>
    %6 = arith.addf %1, %5 : vector<2x4x128xf32>
    %c0_6 = arith.constant 0 : index
    %c0_7 = arith.constant 0 : index
    %c0_8 = arith.constant 0 : index
    %7 = vector.load %arg5[%c0_6, %c0_7, %c0_8] : memref<2x4x128xf32, #tpu.memory_space<vmem>>, vector<2x4x128xf32>
    tpu.vector_store %arg5[%c0_6, %c0_7, %c0_8], %6 {strides = array<i32>} : memref<2x4x128xf32, #tpu.memory_space<vmem>>, vector<2x4x128xf32>,
    return
  }
  func.func @transform_0(%arg0: i32, %arg1: i32) -> i32 {
    %c0_i32 = arith.constant 0 : i32
    %c0_i32_0 = arith.constant 0 : i32
    return %c0_i32 : i32
  }
  func.func @transform_1(%arg0: i32, %arg1: i32) -> (i32, i32, i32) {
    %c0_i32 = arith.constant 0 : i32
    %c0_i32_0 = arith.constant 0 : i32
    return %arg0, %c0_i32, %arg1 : i32, i32, i32
  }
  func.func @transform_2(%arg0: i32, %arg1: i32) -> (i32, i32, i32) {
    %c0_i32 = arith.constant 0 : i32
    %c0_i32_0 = arith.constant 0 : i32
    return %arg0, %c0_i32, %arg1 : i32, i32, i32
  }
  func.func @transform_3(%arg0: i32, %arg1: i32) -> (i32, i32, i32) {
    %c0_i32 = arith.constant 0 : i32
    %c0_i32_0 = arith.constant 0 : i32
    return %arg0, %c0_i32, %arg1 : i32, i32, i32
  }
}

</mosaic_0001>

<bundles_post_ra>
// kernel: tpu_custom_call.1
= control target key start
LH: loop header
LB: loop body
LE: loop exit
PB: predicated region body
PF: predicated region fallthrough
CT: control target
= control target key end

     0   :  { %s848_s0 = inlined_call_operand.<no memory space> [shape: f32[1], index: 0, kind: input, shape index: {}]   ;;  %s849_s1 = inlined_call_operand.hbm [shape: f32[2,4,256], index: 1, kind: input, shape index: {}]   ;;  %s850_s2 = inlined_call_operand.hbm [shape: f32[2,1,256], index: 2, kind: input, shape index: {}]   ;;  %s851_s3 = inlined_call_operand.hbm [shape: f32[2,4,256], index: 3, kind: output, shape index: {}]  }
   0x1   :  { %852 = sst [smem:[#allocation12_spill]] %s849_s1 }
   0x2   :  { %8 = sst [smem:[#allocation2]] %s848_s0 }
   0x3   :  { %9 = vsyncpa [#allocation4], 0 }
   0x4   :  { %11 = vsyncpa [#allocation4 + $0x1], 0 }
   0x5   :  { %12 = vsyncpa [#allocation7], 0 }
   0x6   :  { %14 = vsyncpa [#allocation7 + $0x1], 0 }
   0x7   :  { %15 = vsyncpa [#allocation5], 0 }
   0x8   :  { %17 = vsyncpa [#allocation5 + $0x1], 0  ;;  %s674_s14 = smov 0   ;;  %s676_s15 = smov 0  }
   0x9   :  { %s678_s16 = smov 0   ;;  %s680_s17 = smov 0  }
   0xa   :  { %s682_s18 = smov 0   ;;  %s684_s19 = smov 0  }
   0xb LB: > { %s405_s0 = sadd.s32 4294967295, %s637_s19   ;;  %s406_s20 = sadd.s32 4294967294, %s637_s19   ;;  %s637_s19 = sphi %s684_s19, %s23_s19   ;;  %s633_s18 = sphi %s682_s18, %s864_s18   ;;  %s629_s17 = sphi %s680_s17, %s863_s17   ;;  %s625_s16 = sphi %s678_s16, %s862_s16   ;;  %s621_s15 = sphi %s676_s15, %s861_s15   ;;  %s617_s14 = sphi %s674_s14, %s860_s14  }
   0xc   : > { %s32_s21 = sadd.s32 1, %s633_s18  ;;  %s65_s22 = sadd.s32 1, %s625_s16 }
   0xd   : > { %p33_p0 = scmp.ge.s32.totalorder %s32_s21, 2  ;;  %p72_p1 = scmp.ne.s32.totalorder %s625_s16, %s621_s15 }
   0xe   : > { %p73_p2 = scmp.eq.s32.totalorder %s637_s19, 0  ;;  %p78_p3 = scmp.ne.s32.totalorder %s621_s15, %s617_s14 }
   0xf   : > { %s866_s21 = smov (%p33_p0, %s32_s21), 0  ;;  %p79_p5 = scmp.eq.s32.totalorder %s405_s0, 0 }
  0x10   : > { %p715_p4 = por %p73_p2, %p72_p1  ;;  %s61_s24 = ssub.s32 %s633_s18, %s866_s21 }
  0x11   : > { %p132_p6 = scmp.eq.s32.totalorder %s405_s0, 1  ;;  %p63_p7 = scmp.eq.s32.totalorder %s61_s24, 0 }
  0x12   : > { %p721_p8 = por %p79_p5, %p78_p3  ;;  %p138_p10 = scmp.eq.s32.totalorder %s406_s20, 1 }
  0x13   : > { %p725_p9 = por %p132_p6, %p72_p1  ;;  %p408_p12 = scmp.ge.s32.totalorder %s637_s19, 2 }
  0x14   : > { %s730_s27 = scalar_select %p63_p7, %s625_s16, %s65_s22  }
  0x15   : > { %p732_p11 = por %p138_p10, %p78_p3  ;;  %p438_p13 = scmp.lt.s32.totalorder %s637_s19, 2 }
  0x16   : > { %s739_s29 = sand.u32 1, %s625_s16   ;;  %s410_s4 = sshll.u32 %s633_s18, 6 }
  0x17   : > { %s409_s30 = sshll.u32 %s739_s29, 3  ;;  %s857_s1 = sld [smem:[#allocation12_spill]] }
  0x18   : > { %s165_s8 = scalar_lea.vmem [#allocation3], %s409_s30  ;;  %p748_p0 = pnand %p438_p13, %p715_p4 }
  0x19   : > { %s174_s9 = sshll.u32 %s165_s8, 4  ;;  %s162_s11 = scalar_lea.sflag [#allocation4], %s739_s29  ;;  %s175_s9 = int_to_ptr.vmem [resolvable:$true] %s174_s9 }
  0x1a   : > { %p499_p1 = pneg %p748_p0  ;;  %s510_s12 = scalar_lea.vmem %s175_s9, 128 }
  0x1b   : > { %p511_p2 = scmp.ne.s32.totalorder %s175_s9, %s510_s12  ;;  %s639_s13 = smov [#allocation3]  }
  0x1c   : > { %s515_s0 = sshll.u32 %s639_s13, 4  ;;  %s516_s0 = int_to_ptr.vmem [resolvable:$false] %s515_s0 }
  0x1d   : > { %s173_s7 = scalar_lea.hbm %s857_s1, %s410_s4  ;;  %p513_p3 = pnand %p511_p2, %p499_p1 }
  0x1e   : > { %s517_s20 = scalar_lea.vmem %s516_s0, 256  ;;  %p518_p6 = scmp.lt.s32.totalorder %s175_s9, %s516_s0 }
  0x1f   : > { %p514_p5 = pneg %p513_p3  ;;  %p519_p4 = scmp.lt.s32.totalorder %s517_s20, %s510_s12 }
  0x21   : > { %p520_p7 = por %p519_p4, %p518_p6 }
  0x23   : > { %p521_p10 = pnand %p520_p7, %p514_p5 }
  0x25   : > { %524 = shalt.err (!%p521_p10)
}
  0x26   : > { %s640_s22 = smov 128   ;;  %s641_s23 = smov 64  }
  0x27   : > { %s642_s24 = smov 4   ;;  %p413_p13 = scmp.ge.s32.totalorder %s637_s19, 1 }
  0x28   : > { %430 = dma.hbm_to_vmem [thread:$0]  (!%p748_p0), %s173_s7, 128, %s175_s9, %s162_s11, %s640_s22, %s641_s23, %s642_s24  }
  0x29   : > { %p205_p2 = scmp.lt.s32.totalorder %s637_s19, 3  ;;  %s411_s30 = sshll.u32 %s739_s29, 1 }
  0x2a   : > { %s412_s5 = sshll.u32 %s633_s18, 4  ;;  %s188_s6 = scalar_lea.vmem [#allocation6], %s411_s30 }
  0x2b   : > { %p763_p3 = pnand %p413_p13, %p205_p2  ;;  %s197_s8 = sshll.u32 %s188_s6, 4  ;;  %s198_s8 = int_to_ptr.vmem [resolvable:$true] %s197_s8 }
  0x2c   : > { %s196_s0 = scalar_lea.hbm %s850_s2, %s412_s5  ;;  %s185_s20 = scalar_lea.sflag [#allocation7], %s739_s29 }
  0x2d   : > { %s538_s1 = scalar_lea.vmem %s198_s8, 32  ;;  %s643_s7 = smov [#allocation6]  }
  0x2e   : > { %p539_p5 = scmp.ne.s32.totalorder %s198_s8, %s538_s1  ;;  %s543_s9 = sshll.u32 %s643_s7, 4  ;;  %s544_s9 = int_to_ptr.vmem [resolvable:$false] %s543_s9 }
  0x2f   : > { %s545_s11 = scalar_lea.vmem %s544_s9, 64  ;;  %p546_p7 = scmp.lt.s32.totalorder %s198_s8, %s544_s9 }
  0x30   : > { %p541_p6 = pnand %p539_p5, %p499_p1  ;;  %p547_p10 = scmp.lt.s32.totalorder %s545_s11, %s538_s1 }
  0x32   : > { %p542_p4 = pneg %p541_p6  ;;  %p548_p13 = por %p547_p10, %p546_p7 }
  0x34   : > { %p549_p2 = pnand %p548_p13, %p542_p4 }
  0x36   : > { %552 = shalt.err (!%p549_p2)
}
  0x37   : > { %s644_s22 = smov 32   ;;  %s645_s23 = smov 16  }
  0x38   : > { %s646_s24 = smov 1   ;;  %209 = sbr.rel (%p763_p3) target bundleno = 93 (0x5d), region = 32 }
  0x39   : > { %433 = dma.hbm_to_vmem [thread:$0]  (!%p748_p0), %s196_s0, 32, %s198_s8, %s185_s20, %s644_s22, %s645_s23, %s646_s24  }
  0x3a   : > { %s780_s29 = sand.u32 (!%p763_p3), 1, %s621_s15  }
  0x3b   : > { %s414_s30 = sshll.u32 (!%p763_p3), %s780_s29, 3  ;;  %s212_s1 = scalar_lea.sflag (!%p763_p3), [#allocation4], %s780_s29 }
  0x3c   : > { %s215_s5 = scalar_lea.vmem (!%p763_p3), [#allocation3], %s414_s30 }
  0x3d   : > { %604 = dma.done.wait (%p721_p8), %s212_s1, 128  }
  0x3e   : > { %606 = vsyncadd (%p721_p8), %s212_s1, 4294967168  ;;  %s415_s10 = sshll.u32 %s780_s29, 1  ;;  %s221_s4 = scalar_lea.sflag [#allocation7], %s780_s29 }
  0x3f   : > { %s224_s6 = scalar_lea.vmem [#allocation6], %s415_s10 }
  0x40   : > { %608 = dma.done.wait (%p721_p8), %s221_s4, 32  }
  0x41   : > { %610 = vsyncadd (%p721_p8), %s221_s4, 4294967264  ;;  %v265_v0 = vlaneseq  ;;  %s255_s8 = sld [smem:[#allocation2]]  ;;  %v258_v3 = vld [vmem:[%s224_s6] sm:$0x1]  ;;  %s251_s12 = scalar_lea.vmem [#allocation8], %s414_s30 }
  0x42   : > { %s295_s13 = sshll.u32 %s251_s12, 4  ;;  %v259_v6 = vld [vmem:[%s224_s6 + $0x1] sm:$0x1]  ;;  %v256_v7 = vld [vmem:[%s215_s5] sm:$0xf]  ;;  %s418_s0 = sshll.u32 %s629_s17, 6  ;;  %s795_s13 = int_to_ptr.vmem [resolvable:$true] %s295_s13 }
  0x43   : > { %v266_v1 = vshrl.u32 %v265_v0, 7  ;;  %v257_v10 = vld [vmem:[%s215_s5 + $0x4] sm:$0xf]  ;;  %s800_s7 = scalar_lea.hbm %s851_s3, %s418_s0  ;;  %s280_s9 = scalar_lea.sflag [#allocation5], %s780_s29 }
  0x44   : > { %s553_s11 = scalar_lea.vmem %s795_s13, 128  ;;  %s647_s17 = smov [#allocation8]  }
  0x45   : > { %v267_v2 = vsub.s32 0, %v266_v1  ;;  %p554_p8 = scmp.ne.s32.totalorder %s795_s13, %s553_s11  ;;  %s557_s22 = sshll.u32 %s647_s17, 4  ;;  %s558_s22 = int_to_ptr.vmem [resolvable:$false] %s557_s22 }
  0x46   : > { %s559_s23 = scalar_lea.vmem %s558_s22, 256  ;;  %p560_p3 = scmp.lt.s32.totalorder %s795_s13, %s558_s22 }
  0x47   : > { %v260_v4 = vstv %s255_s8  ;;  %p555_p0 = pnand %p554_p8, %p725_p9  ;;  %p561_p5 = scmp.lt.s32.totalorder %s559_s23, %s553_s11 }
  0x48   : > { %v261_v5 = vmul.f32 %v260_v4, %v258_v3  ;;  %v262_v8 = vmul.f32 %v260_v4, %v259_v6 }
  0x49   : > { %p556_p1 = pneg %p555_p0  ;;  %p562_p6 = por %p561_p5, %p560_p3 }
  0x4a   : > { %v268_v9 = vrot.slane %v261_v5, %v267_v2  ;;  %v272_v11 = vrot.slane %v262_v8, %v267_v2 }
  0x4b   : > { %p563_p4 = pnand %p562_p6, %p556_p1 }
  0x4c   : > { %v275_v12 = vadd.f32 %v268_v9, %v256_v7  ;;  %v276_v13 = vadd.f32 %v272_v11, %v257_v10 }
  0x4e   : > { %277 = vst [vmem:[%s251_s12] sm:$0xf] %v275_v12  ;;  %278 = vst [vmem:[%s251_s12 + $0x4] sm:$0xf] %v276_v13 }
  0x4f   : > { %566 = shalt.err (!%p563_p4)
}
  0x50   : > { %s567_s24 = scalar_lea.hbm %s800_s7, 128  ;;  %s571_s5 = scalar_lea.hbm %s851_s3, 256 }
  0x51   : > { %p568_p7 = scmp.ne.s32.totalorder %s800_s7, %s567_s24  ;;  %p572_p2 = scmp.lt.s32.totalorder %s800_s7, %s851_s3 }
  0x52   : > { %p573_p8 = scmp.lt.s32.totalorder %s571_s5, %s567_s24 }
  0x53   : > { %p569_p10 = pnand %p568_p7, %p725_p9 }
  0x54   : > { %p574_p0 = por %p573_p8, %p572_p2 }
  0x55   : > { %p570_p13 = pneg %p569_p10 }
  0x57   : > { %p575_p1 = pnand %p574_p0, %p570_p13 }
  0x59   : > { %578 = shalt.err (!%p575_p1)
}
  0x5a   : > { %s648_s6 = smov 64   ;;  %s649_s8 = smov 128  }
  0x5b   : > { %s650_s12 = smov 4  }
  0x5c   : > { %425 = dma.vmem_to_hbm [thread:$0]  (%p725_p9), %s795_s13, 128, %s800_s7, %s280_s9, %s648_s6, %s649_s8, %s650_s12  }
  0x5d PF: > { %s310_s0 = sand.u32 1, %s617_s14   ;;  %p435_p3 = pnand %p408_p12, %p732_p11 }
  0x5e   : > { %s311_s25 = scalar_lea.sflag [#allocation5], %s310_s0 }
  0x5f   : > { %p436_p5 = pneg %p435_p3 }
  0x61   : > { %612 = dma.done.wait (%p436_p5), %s311_s25, 128  }
  0x62   : > { %614 = vsyncadd (%p436_p5), %s311_s25, 4294967168  ;;  %s23_s19 = sadd.s32 1, %s637_s19   ;;  %s860_s14 = smov %s621_s15 }
  0x63   : > { %p20_p6 = scmp.ge.s32.totalorder %s23_s19, 4   ;;  %s861_s15 = smov %s625_s16 }
  0x64   : > { %s862_s16 = smov %s730_s27  ;;  %s863_s17 = smov %s633_s18 }
  0x65   : > { %s864_s18 = smov %s866_s21  ;;  %22 = sbr.rel (!%p20_p6) target bundleno = 11 (0xb), region = 90 }
  0x6a   :  { %316 = vsyncpa [#allocation4], 1 }
  0x6b   :  { %318 = vsyncpa [#allocation4 + $0x1], 1 }
  0x6c   :  { %319 = vsyncpa [#allocation7], 1 }
  0x6d   :  { %321 = vsyncpa [#allocation7 + $0x1], 1 }
  0x6e   :  { %322 = vsyncpa [#allocation5], 1 }
  0x6f   :  { %324 = vsyncpa [#allocation5 + $0x1], 1 }

</bundles_post_ra>
